<compile_context>
chip_gen: v7x
topology: tpu7x:2x2x1
jax: 0.10.0
libtpu: 0.0.40
codegen_flags: <defaults>
</compile_context>

<pallas_src>
import functools

import jax
import jax.numpy as jnp
from jax.experimental import pallas as pl
from jax.experimental.pallas import tpu as pltpu

NEG_SLOPE = 0.2      # PyG GATConv default leaky_relu slope
NEG_INF = -1e30
LANE = 128


def _round_up(x, m):
    return (x + m - 1) // m * m


def _cparams(vmem_bytes=48 * 1024 * 1024):
    return pltpu.CompilerParams(dimension_semantics=("parallel",),
                                vmem_limit_bytes=vmem_bytes)


# ------------------------- k0: xw = x @ W (H padded) -------------------------
def _xw_kernel(x_ref, w_ref, o_ref):
    o_ref[...] = jnp.dot(x_ref[...], w_ref[...],
                         preferred_element_type=jnp.float32).astype(o_ref.dtype)


# --------------- k1: framelet branches + GAT pre-computation -----------------
def _branch_kernel(d_ref, xw_ref, filt_ref, w23_ref, asrcw_ref, adstw_ref,
                   x1f_ref, hs_ref, asrc_ref, adst_ref):
    three, tm, n = d_ref.shape
    hp = xw_ref.shape[1]

    # one fused (3*TM, N) @ (N, Hp) MXU launch for all three framelet branches
    d = d_ref[...].reshape(three * tm, n)
    xall = jnp.dot(d, xw_ref[...], preferred_element_type=jnp.float32)
    xall = xall.reshape(three, tm, hp)

    # branch 1: per-node learnable filter (shrinkage=None path)
    x1f_ref[...] = (xall[0] * filt_ref[...]).astype(x1f_ref.dtype)

    # branches 2 & 3 batched: h_b = x_b @ w_b, attention logit halves
    x23 = xall[1:3].astype(jnp.bfloat16)                       # (2, TM, Hp)
    h = jnp.einsum('bth,bhk->btk', x23, w23_ref[...],
                   preferred_element_type=jnp.float32)          # (2, TM, Hp)
    hs_ref[...] = h.astype(hs_ref.dtype)
    asrc_ref[...] = jnp.sum(h * asrcw_ref[...], axis=-1)                 # (2, TM)
    adst_ref[...] = jnp.sum(h * adstw_ref[...], axis=-1, keepdims=True)  # (2, TM, 1)


# ------------------ k2: batched dense masked GAT attention -------------------
def _gat_kernel(adj_ref, hs_ref, asrc_ref, adst_ref, b_ref, o_ref):
    adj = adj_ref[...]                                          # (TM, N) 0/1 bf16
    neg = jnp.where(adj > 0, 0.0, NEG_INF)                      # additive mask, once
    e = adst_ref[...] + asrc_ref[...][:, None, :]               # (2, TM, N)
    e = jnp.where(e > 0, e, NEG_SLOPE * e)                      # leaky_relu
    e = e + neg[None, :, :]                                     # mask non-edges
    m = jnp.max(e, axis=-1, keepdims=True)
    p = jnp.exp(e - m)
    s = jnp.sum(p, axis=-1, keepdims=True)
    alpha = (p * pl.reciprocal(s, approx=True)).astype(jnp.bfloat16)
    o = jnp.einsum('btn,bnh->bth', alpha, hs_ref[...],
                   preferred_element_type=jnp.float32)          # (2, TM, Hp)
    o = o + b_ref[...]
    o = jnp.where(o > 0, o, jnp.expm1(jnp.minimum(o, 0.0)))     # ELU (eval mode)
    o_ref[...] = o.astype(o_ref.dtype)


# -------- k3: D^T contraction + bias + relu + masked log_softmax -------------
def _head_kernel(dt_ref, br_ref, bias_ref, o_ref, *, h_valid):
    out = jnp.dot(dt_ref[...], br_ref[...],
                  preferred_element_type=jnp.float32)           # (TM, Hp)
    out = jnp.maximum(out + bias_ref[...], 0.0)                 # relu
    col = jax.lax.broadcasted_iota(jnp.int32, out.shape, 1)
    valid = col < h_valid                                       # exclude lane padding
    z = jnp.where(valid, out, NEG_INF)
    z = z - jnp.max(z, axis=-1, keepdims=True)
    ez = jnp.where(valid, jnp.exp(z), 0.0)
    o_ref[...] = z - jnp.log(jnp.sum(ez, axis=-1, keepdims=True))


# ------------------------------ wrapper ---------------------------------------
def net_forward(x, weight, D, filter1, adj,
                w2, asrc2, adst2, b2,
                w3, asrc3, adst3, b3, bias, *, tile=256):
    n, f_in = x.shape
    h = weight.shape[1]
    np_ = _round_up(n, tile)
    hp = _round_up(h, LANE)
    bf, f32 = jnp.bfloat16, jnp.float32
    pad_n, pad_h = np_ - n, hp - h

    # pad to tile/lane multiples; cast big N^2 operands to bf16
    x_p = jnp.pad(x, ((0, pad_n), (0, 0))).astype(bf)
    w_p = jnp.pad(weight, ((0, 0), (0, pad_h))).astype(bf)
    d_p = jnp.pad(D, ((0, 0), (0, pad_n), (0, pad_n))).astype(bf)
    # lane-dense stacked transpose: (N, 3N) = [D1^T | D2^T | D3^T]
    dt_p = jnp.concatenate([d_p[0].T, d_p[1].T, d_p[2].T], axis=1)
    adj_p = jnp.pad(adj, ((0, pad_n), (0, pad_n))).astype(bf)
    filt_p = jnp.pad(filter1, ((0, pad_n), (0, 0))).astype(f32)
    w23 = jnp.pad(jnp.stack([w2, w3]), ((0, 0), (0, pad_h), (0, pad_h))).astype(bf)
    asrcw = jnp.pad(jnp.stack([asrc2, asrc3]), ((0, 0), (0, 0), (0, pad_h))).astype(f32)
    adstw = jnp.pad(jnp.stack([adst2, adst3]), ((0, 0), (0, 0), (0, pad_h))).astype(f32)
    b23 = jnp.pad(jnp.stack([b2, b3]), ((0, 0), (0, 0), (0, pad_h))).astype(f32)
    bias_p = jnp.pad(bias, ((0, 0), (0, pad_h))).astype(f32)

    grid = (np_ // tile,)

    # k0: xw = x @ W
    xw = pl.pallas_call(
        _xw_kernel,
        grid=grid,
        in_specs=[pl.BlockSpec((tile, f_in), lambda i: (i, 0)),
                  pl.BlockSpec((f_in, hp), lambda i: (0, 0))],
        out_specs=pl.BlockSpec((tile, hp), lambda i: (i, 0)),
        out_shape=jax.ShapeDtypeStruct((np_, hp), bf),
        compiler_params=_cparams(),
    )(x_p, w_p)

    # k1: framelet branches + GAT pre-compute (streams D row tiles)
    x1f, hs, asrc, adst = pl.pallas_call(
        _branch_kernel,
        grid=grid,
        in_specs=[
            pl.BlockSpec((3, tile, np_), lambda i: (0, i, 0)),   # D row tile
            pl.BlockSpec((np_, hp), lambda i: (0, 0)),           # xw (resident)
            pl.BlockSpec((tile, 1), lambda i: (i, 0)),           # filter1
            pl.BlockSpec((2, hp, hp), lambda i: (0, 0, 0)),      # w2/w3
            pl.BlockSpec((2, 1, hp), lambda i: (0, 0, 0)),       # att_src
            pl.BlockSpec((2, 1, hp), lambda i: (0, 0, 0)),       # att_dst
        ],
        out_specs=(
            pl.BlockSpec((tile, hp), lambda i: (i, 0)),          # x1f
            pl.BlockSpec((2, tile, hp), lambda i: (0, i, 0)),    # h2/h3
            pl.BlockSpec((2, tile), lambda i: (0, i)),           # a_src
            pl.BlockSpec((2, tile, 1), lambda i: (0, i, 0)),     # a_dst
        ),
        out_shape=(
            jax.ShapeDtypeStruct((np_, hp), bf),
            jax.ShapeDtypeStruct((2, np_, hp), bf),
            jax.ShapeDtypeStruct((2, np_), f32),
            jax.ShapeDtypeStruct((2, np_, 1), f32),
        ),
        compiler_params=_cparams(),
        cost_estimate=pl.CostEstimate(
            flops=2 * 3 * np_ * np_ * hp + 2 * 2 * np_ * hp * hp,
            transcendentals=0,
            bytes_accessed=3 * np_ * np_ * 2 + 6 * np_ * hp * 2),
    )(d_p, xw, filt_p, w23, asrcw, adstw)

    # k2: batched GAT attention (streams adj row tiles)
    o23 = pl.pallas_call(
        _gat_kernel,
        grid=grid,
        in_specs=[
            pl.BlockSpec((tile, np_), lambda i: (i, 0)),         # adj row tile
            pl.BlockSpec((2, np_, hp), lambda i: (0, 0, 0)),     # h2/h3 (resident)
            pl.BlockSpec((2, np_), lambda i: (0, 0)),            # a_src (resident)
            pl.BlockSpec((2, tile, 1), lambda i: (0, i, 0)),     # a_dst tile
            pl.BlockSpec((2, 1, hp), lambda i: (0, 0, 0)),       # GAT biases
        ],
        out_specs=pl.BlockSpec((2, tile, hp), lambda i: (0, i, 0)),
        out_shape=jax.ShapeDtypeStruct((2, np_, hp), bf),
        compiler_params=_cparams(),
        cost_estimate=pl.CostEstimate(
            flops=2 * 2 * np_ * np_ * hp + 10 * np_ * np_,
            transcendentals=2 * np_ * np_,
            bytes_accessed=np_ * np_ * 2 + 6 * np_ * hp * 2),
    )(adj_p, hs, asrc, adst, b23)

    # k3: fused transposed contraction + relu + masked log_softmax
    br = jnp.concatenate([x1f[None], o23], axis=0).reshape(3 * np_, hp)
    out = pl.pallas_call(
        functools.partial(_head_kernel, h_valid=h),
        grid=grid,
        in_specs=[
            pl.BlockSpec((tile, 3 * np_), lambda i: (i, 0)),     # [D^T] row tile
            pl.BlockSpec((3 * np_, hp), lambda i: (0, 0)),       # branches (resident)
            pl.BlockSpec((1, hp), lambda i: (0, 0)),             # UFGConv bias
        ],
        out_specs=pl.BlockSpec((tile, hp), lambda i: (i, 0)),
        out_shape=jax.ShapeDtypeStruct((np_, hp), f32),
        compiler_params=_cparams(),
        cost_estimate=pl.CostEstimate(
            flops=2 * np_ * 3 * np_ * hp,
            transcendentals=np_,
            bytes_accessed=3 * np_ * np_ * 2 + 3 * np_ * hp * 2 + np_ * hp * 4),
    )(dt_p, br, bias_p)

    return out[:n, :h]


# ------------------------ pure-JAX f32 reference ------------------------------
def net_reference(x, weight, D, filter1, adj,
                  w2, asrc2, adst2, b2, w3, asrc3, adst3, b3, bias):
    def gat(h_in, w, a_s, a_d, b):
        hh = h_in @ w
        s = jnp.sum(hh * a_s, axis=-1, keepdims=True)
        d = jnp.sum(hh * a_d, axis=-1, keepdims=True)
        e = d + s.T
        e = jnp.where(e > 0, e, NEG_SLOPE * e)
        e = jnp.where(adj > 0, e, NEG_INF)
        e = e - jnp.max(e, axis=-1, keepdims=True)
        p = jnp.exp(e)
        alpha = p / jnp.sum(p, axis=-1, keepdims=True)
        return alpha @ hh + b

    def elu(v):
        return jnp.where(v > 0, v, jnp.expm1(jnp.minimum(v, 0.0)))

    xw = x @ weight
    x1 = filter1 * (D[0] @ xw)
    x2 = elu(gat(D[1] @ xw, w2, asrc2, adst2, b2))
    x3 = elu(gat(D[2] @ xw, w3, asrc3, adst3, b3))
    out = D[0].T @ x1 + D[1].T @ x2 + D[2].T @ x3 + bias
    return jax.nn.log_softmax(jnp.maximum(out, 0.0), axis=1)


def _glorot(key, shape):
    fan_in = shape[-2] if len(shape) > 1 else 1
    fan_out = shape[-1]
    bound = (6.0 / (fan_in + fan_out)) ** 0.5
    return jax.random.uniform(key, shape, jnp.float32, -bound, bound)


if __name__ == "__main__":
    # small synthetic graph consistent with the module's forward
    N = 512          # num_nodes (2 row tiles of 256)
    F_in = 32        # num_features
    H = 16           # nhid
    num_edges = 2048

    key = jax.random.PRNGKey(0)
    keys = jax.random.split(key, 16)

    x = jax.random.normal(keys[0], (N, F_in), jnp.float32)

    # dense framelet operators d_list[1..3] -> (3, N, N)
    D = jax.random.normal(keys[1], (3, N, N), jnp.float32) * (1.0 / N ** 0.5)

    # adjacency mask (symmetric random edges + self-loops), shared by both GATs
    src = jax.random.randint(keys[2], (num_edges,), 0, N)
    dst = jax.random.randint(keys[3], (num_edges,), 0, N)
    adj = jnp.zeros((N, N), jnp.float32)
    adj = adj.at[dst, src].set(1.0)
    adj = adj.at[src, dst].set(1.0)
    adj = adj.at[jnp.arange(N), jnp.arange(N)].set(1.0)   # GATConv add_self_loops

    # UFGConv parameters (synthetic init mirroring reset_parameters)
    weight = _glorot(keys[4], (F_in, H))
    filter1 = jax.random.uniform(keys[5], (N, 1), jnp.float32, 0.9, 1.1)
    bias = jnp.zeros((1, H), jnp.float32)

    # GATconv2 / GATconv3 parameters (heads=1)
    w2 = _glorot(keys[6], (H, H))
    asrc2 = _glorot(keys[7], (1, H))
    adst2 = _glorot(keys[8], (1, H))
    b2 = jnp.zeros((1, H), jnp.float32)

    w3 = _glorot(keys[9], (H, H))
    asrc3 = _glorot(keys[10], (1, H))
    adst3 = _glorot(keys[11], (1, H))
    b3 = jnp.zeros((1, H), jnp.float32)

    args = (x, weight, D, filter1, adj,
            w2, asrc2, adst2, b2,
            w3, asrc3, adst3, b3, bias)

    out = net_forward(*args)
    jax.block_until_ready(out)

    assert out.shape == (N, H)
    # log_softmax rows sum to 1 in prob space
    assert jnp.allclose(jnp.sum(jnp.exp(out), axis=1), 1.0, atol=1e-4)
    # loose check vs pure-JAX f32 reference (kernel uses bf16 operands)
    ref = net_reference(*args)
    max_err = float(jnp.max(jnp.abs(out - ref)))
    assert max_err < 0.5, max_err
    print("KERNEL_OK")
</pallas_src>

<mosaic_0001>
module attributes {stable_mosaic.version = 11 : i64} {
  func.func @_xw_kernel(%arg0: i32, %arg1: memref<256x32xbf16, #tpu.memory_space<vmem>>, %arg2: memref<32x128xbf16, #tpu.memory_space<vmem>>, %arg3: memref<256x128xbf16, #tpu.memory_space<vmem>>) attributes {dimension_semantics = [#tpu.dimension_semantics<parallel>], iteration_bounds = array<i64: 2>, scalar_prefetch = 0 : i64, scratch_operands = 0 : i64, tpu.core_type = #tpu.core_type<tc>, window_params = [{transform_indices = @transform_0, window_bounds = array<i64: 256, 32>}, {pipeline_mode = #tpu.pipeline_mode<synchronous>, transform_indices = @transform_1, window_bounds = array<i64: 32, 128>}, {transform_indices = @transform_2, window_bounds = array<i64: 256, 128>}]} {
    %c0 = arith.constant 0 : index
    %c0_0 = arith.constant 0 : index
    %0 = vector.load %arg1[%c0, %c0_0] : memref<256x32xbf16, #tpu.memory_space<vmem>>, vector<256x32xbf16>
    %c0_1 = arith.constant 0 : index
    %c0_2 = arith.constant 0 : index
    %1 = vector.load %arg2[%c0_1, %c0_2] : memref<32x128xbf16, #tpu.memory_space<vmem>>, vector<32x128xbf16>
    %cst = arith.constant dense<0.000000e+00> : vector<256x128xf32>
    %2 = tpu.matmul %0, %1, %cst {dimension_numbers = #tpu.dot_dimension_numbers<[1], [0], [0], [1], [0, 0, 1, 1], [], []>} : vector<256x32xbf16>, vector<32x128xbf16>, vector<256x128xf32> -> vector<256x128xf32>
    %3 = arith.truncf %2 : vector<256x128xf32> to vector<256x128xbf16>
    %c0_3 = arith.constant 0 : index
    %c0_4 = arith.constant 0 : index
    %4 = vector.load %arg3[%c0_3, %c0_4] : memref<256x128xbf16, #tpu.memory_space<vmem>>, vector<256x128xbf16>
    tpu.vector_store %arg3[%c0_3, %c0_4], %3 {strides = array<i32>} : memref<256x128xbf16, #tpu.memory_space<vmem>>, vector<256x128xbf16>,
    return
  }
  func.func @transform_0(%arg0: i32) -> (i32, i32) {
    %c0_i32 = arith.constant 0 : i32
    %c0_i32_0 = arith.constant 0 : i32
    return %arg0, %c0_i32 : i32, i32
  }
  func.func @transform_1(%arg0: i32) -> (i32, i32) {
    %c0_i32 = arith.constant 0 : i32
    %c0_i32_0 = arith.constant 0 : i32
    %c0_i32_1 = arith.constant 0 : i32
    return %c0_i32, %c0_i32_0 : i32, i32
  }
  func.func @transform_2(%arg0: i32) -> (i32, i32) {
    %c0_i32 = arith.constant 0 : i32
    %c0_i32_0 = arith.constant 0 : i32
    return %arg0, %c0_i32 : i32, i32
  }
}

</mosaic_0001>

<bundles_post_ra>
// kernel: tpu_custom_call.1
= control target key start
LH: loop header
LB: loop body
LE: loop exit
PB: predicated region body
PF: predicated region fallthrough
CT: control target
= control target key end

     0   :  { %7 = vsyncpa [#allocation3], 0  ;;  %s1290_s0 = inlined_call_operand.vmem [shape: bf16[512,32], index: 0, kind: input, shape index: {}]   ;;  %s1291_s1 = inlined_call_operand.vmem [shape: bf16[32,128], index: 1, kind: input, shape index: {}]   ;;  %s1292_s2 = inlined_call_operand.hbm [shape: bf16[512,128], index: 2, kind: output, shape index: {}]  }
   0x1   :  { %9 = vsyncpa [#allocation3 + $0x1], 0  ;;  %s1125_s9 = smov 0   ;;  %s1127_s10 = smov 0  }
   0x2   :  { %s1129_s11 = smov 0   ;;  %s1131_s12 = smov 0  }
   0x3 LB: > { %s1146_s13 = sadd.s32 4294967295, %s1105_s12   ;;  %s720_s14 = sadd.s32 4294967294, %s1105_s12   ;;  %s1105_s12 = sphi %s1131_s12, %s1298_s12   ;;  %s1101_s11 = sphi %s1129_s11, %s1297_s11   ;;  %s1097_s10 = sphi %s1127_s10, %s1296_s10   ;;  %s1093_s9 = sphi %s1125_s9, %s1295_s9  }
   0x4   : > { %s1150_s15 = sadd.s32 1, %s1105_s12   ;;  %s69_s16 = sadd.s32 1, %s1101_s11 }
   0x5   : > { %s66_s17 = ssub.s32 %s1105_s12, %s1150_s15  ;;  %p79_p0 = scmp.ne.s32.totalorder %s1101_s11, %s1097_s10 }
   0x6   : > { %p67_p1 = scmp.eq.s32.totalorder %s66_s17, 0  ;;  %p80_p2 = scmp.eq.s32.totalorder %s1146_s13, 1 }
   0x7   : > { %p85_p3 = scmp.ne.s32.totalorder %s1097_s10, %s1093_s9  ;;  %p86_p4 = scmp.eq.s32.totalorder %s720_s14, 1 }
   0x8   : > { %s1161_s18 = scalar_select %p67_p1, %s1101_s11, %s69_s16  }
   0x9   : > { %p1163_p5 = por %p80_p2, %p79_p0  ;;  %p1167_p6 = por %p86_p4, %p85_p3 }
   0xa   : > { %p723_p7 = scmp.ge.s32.totalorder %s1105_s12, 1  ;;  %p116_p8 = scmp.lt.s32.totalorder %s1105_s12, 3 }
   0xc   : > { %p117_p9 = pnand %p723_p7, %p116_p8 }
   0xd   : > { %v1025_v0 = vld [vmem:[%s1291_s1] sm:$0xff] (!%p117_p9)   ;;  %s725_s23 = sshll.u32 (!%p117_p9), %s1146_s13, 5  ;;  %v1026_v1 = vld [vmem:[%s1291_s1 + $0x8] sm:$0xff] (!%p117_p9)   ;;  %vm274_vm0 = vcmask (!%p117_p9), 261120   ;;  %s135_s30 = sand.u32 (!%p117_p9), 1, %s1097_s10  }
   0xe   : > { %120 = sbr.rel (%p117_p9) target bundleno = 283 (0x11b), region = 28  ;;  %p139_p10 = scmp.lt.s32.totalorder (!%p117_p9), %s725_s23, 63  ;;  %944 = vmatprep.subr.bf16.mxu0 (!%p117_p9), %v1025_v0  ;;  %980 = vmatprep.subr.bf16.mxu1 (!%p117_p9), %v1025_v0 }
   0xf   : > { %945 = vmatpush3.bf16.msra.mxu0 (!%p117_p9), %v1025_v0  ;;  %982 = vmatpush3.bf16.msra.mxu1 (!%p117_p9), %v1025_v0  ;;  %s724_s3 = sshll.u32 (!%p117_p9), %s135_s30, 7  ;;  %s830_s5 = sshll.u32 (!%p117_p9), %s1146_s13, 11 }
  0x10   : > { %946 = vmatprep.subr.bf16.mxu0 (!%p117_p9), %v1026_v1  ;;  %981 = vmatprep.subr.bf16.mxu1 (!%p117_p9), %v1026_v1  ;;  %s1220_s4 = scalar_lea.vmem (!%p117_p9), [#allocation2], %s724_s3  ;;  %s1239_s14 = scalar_lea.hbm (!%p117_p9), %s1292_s2, %s830_s5 }
  0x11   : > { %s658_s6 = sshll.u32 (!%p117_p9), %s1220_s4, 4  ;;  %s1249_s13 = scalar_lea.sflag (!%p117_p9), [#allocation3], %s135_s30  ;;  %s1241_s6 = int_to_ptr.vmem [resolvable:$true] %s658_s6 }
  0x12   : > { %s1043_s16 = scalar_lea.vmem (!%p117_p9), %s1241_s6, 2048  ;;  %s1107_s17 = smov (!%p117_p9), [#allocation2]  }
  0x13   : > { %947 = vmatpush3.bf16.msra.mxu0 (!%p117_p9), %v1026_v1  ;;  %983 = vmatpush3.bf16.msra.mxu1 (!%p117_p9), %v1026_v1  ;;  %p1044_p11 = scmp.ne.s32.totalorder (!%p117_p9), %s1241_s6, %s1043_s16  ;;  %s1047_s21 = sshll.u32 (!%p117_p9), %s1107_s17, 4  ;;  %s1048_s21 = int_to_ptr.vmem [resolvable:$false] %s1047_s21 }
  0x14   : > { %s1049_s22 = scalar_lea.vmem (!%p117_p9), %s1048_s21, 4096  ;;  %p1050_p0 = scmp.lt.s32.totalorder (!%p117_p9), %s1241_s6, %s1048_s21 }
  0x15   : > { %s1300_s23 = smov (!%p139_p10, %s725_s23), 63  ;;  %p1045_p12 = pnand %p1044_p11, %p1163_p5 }
  0x16   : > { %s726_s26 = sshll.u32 %s1300_s23, 2  ;;  %p1051_p1 = scmp.lt.s32.totalorder %s1049_s22, %s1043_s16 }
  0x17   : > { %s1183_s29 = scalar_lea.vmem %s1290_s0, %s726_s26  ;;  %p1046_p13 = pneg %p1045_p12 }
  0x18   : > { %v1027_v2 = vld [vmem:[%s1183_s29] sm:$0xff]   ;;  %v1029_v4 = vld [vmem:[%s1183_s29 + $0x8] sm:$0xff]   ;;  %v1031_v6 = vld [vmem:[%s1183_s29 + $0x10] sm:$0xff]   ;;  %p1052_p2 = por %p1051_p1, %p1050_p0 }
  0x19   : > { %v1028_v3 = vld [vmem:[%s1183_s29 + $0x40] sm:$0xff]   ;;  %948 = vmatprep.mubr.msk.bf16.mxu0 %vm274_vm0, %v1027_v2  ;;  %v1030_v5 = vld [vmem:[%s1183_s29 + $0x48] sm:$0xff]   ;;  %v1032_v7 = vld [vmem:[%s1183_s29 + $0x50] sm:$0xff]  }
  0x1a   : > { %964 = vmatprep.mubr.msk.bf16.mxu1 %vm274_vm0, %v1028_v3  ;;  %949 = vmatmul.mubr.msk.bf16.vlgmr.msra.gmra.mrb[0].mxu0 %vm274_vm0, %v1029_v4  ;;  %v1033_v8 = vld [vmem:[%s1183_s29 + $0x18] sm:$0xff]   ;;  %v1035_v10 = vld [vmem:[%s1183_s29 + $0x20] sm:$0xff]   ;;  %v1037_v12 = vld [vmem:[%s1183_s29 + $0x28] sm:$0xff]   ;;  %p1053_p3 = pnand %p1052_p2, %p1046_p13 }
  0x1b   : > { %965 = vmatmul.mubr.msk.bf16.vlgmr.msra.gmra.mrb[0].mxu1 %vm274_vm0, %v1030_v5  ;;  %952 = vmatprep.mubr.msk.bf16.mxu0 %vm274_vm0, %v1031_v6  ;;  %v1034_v9 = vld [vmem:[%s1183_s29 + $0x58] sm:$0xff]   ;;  %v1036_v11 = vld [vmem:[%s1183_s29 + $0x60] sm:$0xff]   ;;  %v1038_v13 = vld [vmem:[%s1183_s29 + $0x68] sm:$0xff]  }
  0x1c   : > { %968 = vmatprep.mubr.msk.bf16.mxu1 %vm274_vm0, %v1032_v7  ;;  %v1039_v14 = vld [vmem:[%s1183_s29 + $0x30] sm:$0xff]   ;;  %v1041_v16 = vld [vmem:[%s1183_s29 + $0x38] sm:$0xff]  }
  0x1d   : > { %v1040_v15 = vld [vmem:[%s1183_s29 + $0x70] sm:$0xff]   ;;  %v1042_v17 = vld [vmem:[%s1183_s29 + $0x78] sm:$0xff]  }
  0x22   : > { %953 = vmatmul.mubr.msk.bf16.gmra.mrb[4].mxu0 %vm274_vm0, %v1033_v8 }
  0x23   : > { %969 = vmatmul.mubr.msk.bf16.gmra.mrb[4].mxu1 %vm274_vm0, %v1034_v9  ;;  %956 = vmatprep.mubr.msk.bf16.mxu0 %vm274_vm0, %v1035_v10 }
  0x24   : > { %972 = vmatprep.mubr.msk.bf16.mxu1 %vm274_vm0, %v1036_v11 }
  0x2a   : > { %957 = vmatmul.mubr.msk.bf16.gmra.mrb[8].mxu0 %vm274_vm0, %v1037_v12 }
  0x2b   : > { %973 = vmatmul.mubr.msk.bf16.gmra.mrb[8].mxu1 %vm274_vm0, %v1038_v13  ;;  %960 = vmatprep.mubr.msk.bf16.mxu0 %vm274_vm0, %v1039_v14 }
  0x2c   : > { %976 = vmatprep.mubr.msk.bf16.mxu1 %vm274_vm0, %v1040_v15 }
  0x32   : > { %961 = vmatmul.mubr.msk.bf16.gmra.mrb[12].mxu0 %vm274_vm0, %v1041_v16 }
  0x33   : > { %977 = vmatmul.mubr.msk.bf16.gmra.mrb[12].mxu1 %vm274_vm0, %v1042_v17 }
  0xed   : > { %v950_v18 = vpop.f32.mrb[0].mxu0 }
  0xee   : > { %v966_v19 = vpop.f32.mrb[0].mxu1  ;;  %v357_v20 = vpop.f32.mrb[1].mxu0 }
  0xef   : > { %v421_v21 = vpop.f32.mrb[1].mxu1  ;;  %v951_v22 = vpop.f32.mrb[2].mxu0 }
  0xf0   : > { %v839_v23 = vpack.c.bf16 %v951_v22, %v950_v18  ;;  %v967_v24 = vpop.f32.mrb[2].mxu1  ;;  %v360_v25 = vpop.f32.mrb[3].mxu0 }
  0xf1   : > { %v879_v26 = vpack.c.bf16 %v967_v24, %v966_v19  ;;  %v834_v27 = vpack.c.bf16 %v360_v25, %v357_v20  ;;  %v424_v28 = vpop.f32.mrb[3].mxu1 }
  0xf2   : > { %911 = vst [vmem:[%s1220_s4 + $0x8] sm:$0xff] %v839_v23   ;;  %v874_v29 = vpack.c.bf16 %v424_v28, %v421_v21 }
  0xf3   : > { %919 = vst [vmem:[%s1220_s4 + $0x48] sm:$0xff] %v879_v26   ;;  %835 = vst [vmem:[%s1220_s4] sm:$0xff] %v834_v27  }
  0xf4   : > { %918 = vst [vmem:[%s1220_s4 + $0x40] sm:$0xff] %v874_v29  }
  0xf5   : > { %v954_v30 = vpop.f32.mrb[4].mxu0 }
  0xf6   : > { %v970_v31 = vpop.f32.mrb[4].mxu1  ;;  %v373_v32 = vpop.f32.mrb[5].mxu0 }
  0xf7   : > { %v437_v33 = vpop.f32.mrb[5].mxu1  ;;  %v955_v34 = vpop.f32.mrb[6].mxu0 }
  0xf8   : > { %v849_v35 = vpack.c.bf16 %v955_v34, %v954_v30  ;;  %v971_v36 = vpop.f32.mrb[6].mxu1  ;;  %v376_v37 = vpop.f32.mrb[7].mxu0 }
  0xf9   : > { %v889_v38 = vpack.c.bf16 %v971_v36, %v970_v31  ;;  %v844_v39 = vpack.c.bf16 %v376_v37, %v373_v32  ;;  %v440_v40 = vpop.f32.mrb[7].mxu1 }
  0xfa   : > { %913 = vst [vmem:[%s1220_s4 + $0x18] sm:$0xff] %v849_v35   ;;  %v884_v41 = vpack.c.bf16 %v440_v40, %v437_v33 }
  0xfb   : > { %921 = vst [vmem:[%s1220_s4 + $0x58] sm:$0xff] %v889_v38   ;;  %912 = vst [vmem:[%s1220_s4 + $0x10] sm:$0xff] %v844_v39  }
  0xfc   : > { %920 = vst [vmem:[%s1220_s4 + $0x50] sm:$0xff] %v884_v41  }
  0xfd   : > { %v958_v42 = vpop.f32.mrb[8].mxu0 }
  0xfe   : > { %v974_v43 = vpop.f32.mrb[8].mxu1  ;;  %v389_v44 = vpop.f32.mrb[9].mxu0 }
  0xff   : > { %v453_v45 = vpop.f32.mrb[9].mxu1  ;;  %v959_v46 = vpop.f32.mrb[10].mxu0 }
 0x100   : > { %v859_v47 = vpack.c.bf16 %v959_v46, %v958_v42  ;;  %v975_v48 = vpop.f32.mrb[10].mxu1  ;;  %v392_v49 = vpop.f32.mrb[11].mxu0 }
 0x101   : > { %v899_v50 = vpack.c.bf16 %v975_v48, %v974_v43  ;;  %v854_v51 = vpack.c.bf16 %v392_v49, %v389_v44  ;;  %v456_v52 = vpop.f32.mrb[11].mxu1 }
 0x102   : > { %915 = vst [vmem:[%s1220_s4 + $0x28] sm:$0xff] %v859_v47   ;;  %v894_v53 = vpack.c.bf16 %v456_v52, %v453_v45 }
 0x103   : > { %923 = vst [vmem:[%s1220_s4 + $0x68] sm:$0xff] %v899_v50   ;;  %914 = vst [vmem:[%s1220_s4 + $0x20] sm:$0xff] %v854_v51  }
 0x104   : > { %922 = vst [vmem:[%s1220_s4 + $0x60] sm:$0xff] %v894_v53  }
 0x105   : > { %v962_v54 = vpop.f32.mrb[12].mxu0 }
 0x106   : > { %v978_v55 = vpop.f32.mrb[12].mxu1  ;;  %v405_v56 = vpop.f32.mrb[13].mxu0 }
 0x107   : > { %v469_v57 = vpop.f32.mrb[13].mxu1  ;;  %v963_v58 = vpop.f32.mrb[14].mxu0 }
 0x108   : > { %v869_v59 = vpack.c.bf16 %v963_v58, %v962_v54  ;;  %v979_v60 = vpop.f32.mrb[14].mxu1  ;;  %v408_v61 = vpop.f32.mrb[15].mxu0 }
 0x109   : > { %v909_v62 = vpack.c.bf16 %v979_v60, %v978_v55  ;;  %v864_v63 = vpack.c.bf16 %v408_v61, %v405_v56  ;;  %v472_v0 = vpop.f32.mrb[15].mxu1 }
 0x10a   : > { %917 = vst [vmem:[%s1220_s4 + $0x38] sm:$0xff] %v869_v59   ;;  %v904_v1 = vpack.c.bf16 %v472_v0, %v469_v57 }
 0x10b   : > { %925 = vst [vmem:[%s1220_s4 + $0x78] sm:$0xff] %v909_v62   ;;  %916 = vst [vmem:[%s1220_s4 + $0x30] sm:$0xff] %v864_v63  }
 0x10c   : > { %924 = vst [vmem:[%s1220_s4 + $0x70] sm:$0xff] %v904_v1  }
 0x10d   : > { %1056 = shalt.err (!%p1053_p3)
}
 0x10e   : > { %s1057_s23 = scalar_lea.hbm %s1239_s14, 2048  ;;  %s1061_s26 = scalar_lea.hbm %s1292_s2, 4096 }
 0x10f   : > { %p1058_p4 = scmp.ne.s32.totalorder %s1239_s14, %s1057_s23  ;;  %p1062_p9 = scmp.lt.u32.totalorder %s1239_s14, %s1292_s2 }
 0x110   : > { %p1063_p10 = scmp.lt.u32.totalorder %s1061_s26, %s1057_s23  ;;  %p1065_p12 = scmp.lt.u32.totalorder %s1057_s23, %s1239_s14 }
 0x111   : > { %p1059_p7 = pnand %p1058_p4, %p1163_p5 }
 0x112   : > { %p1064_p11 = por %p1063_p10, %p1062_p9 }
 0x113   : > { %p1060_p8 = pneg %p1059_p7 }
 0x114   : > { %p1066_p13 = por %p1065_p12, %p1064_p11 }
 0x116   : > { %p1067_p0 = pnand %p1066_p13, %p1060_p8 }
 0x118   : > { %1070 = shalt.err (!%p1067_p0)
}
 0x119   : > { %s1108_s29 = smov 64   ;;  %s1109_s30 = smov 4  }
 0x11a   : > { %984 = dma.vmem_to_hbm [thread:$0]  (%p1163_p5), %s1241_s6, 2048, %s1239_s14, %s1249_s13, %s1108_s29, %s1108_s29, %s1109_s30  }
 0x11b PF: > { %p990_p1 = scmp.ge.s32.totalorder %s1105_s12, 2  ;;  %s673_s3 = sand.u32 1, %s1093_s9  }
 0x11c   : > { %s674_s4 = scalar_lea.sflag [#allocation3], %s673_s3 }
 0x11d   : > { %p987_p2 = pnand %p990_p1, %p1167_p6 }
 0x11f   : > { %1088 = dma.done.wait (!%p987_p2), %s674_s4, 2048  }
 0x120   : > { %1090 = vsyncadd (!%p987_p2), %s674_s4, 4294965248  ;;  %p12_p3 = scmp.ge.s32.totalorder %s1150_s15, 4   ;;  %s1295_s9 = smov %s1097_s10 }
 0x121   : > { %s1296_s10 = smov %s1101_s11  ;;  %s1297_s11 = smov %s1161_s18 }
 0x122   : > { %s1298_s12 = smov %s1150_s15  ;;  %14 = sbr.rel (!%p12_p3) target bundleno = 3 (0x3), region = 63 }
 0x129   :  { %679 = vsyncpa [#allocation3], 1 }
 0x12a   :  { %681 = vsyncpa [#allocation3 + $0x1], 1 }

</bundles_post_ra>
